<compile_context>
chip_gen: v7x
topology: tpu7x:2x2x1
jax: 0.10.0
libtpu: 0.0.40
codegen_flags: <defaults>
</compile_context>

<pallas_src>
import functools
import math

import jax
import jax.numpy as jnp
from jax.experimental import pallas as pl
from jax.experimental.pallas import tpu as pltpu


def _arcface_kernel(cos_ref, label_ref, out_ref, *, s, cos_m, sin_m, tile_c):
    # cos_ref:   (tile_b, tile_c) input tile
    # label_ref: (tile_b, 1) int32 (class id, or -1 for "no margin")
    # out_ref:   (tile_b, tile_c) output tile
    j = pl.program_id(1)                               # C-tile index

    x = cos_ref[...].astype(jnp.float32)
    clamped = jnp.clip(x, -1.0 + 1e-07, 1.0 - 1e-07)

    # Fold the tile offset into the cheap (tile_b, 1) label column instead of
    # the full-tile iota; label == -1 becomes a negative local index that can
    # never equal a column id in [0, tile_c), so no explicit -1 mask is needed.
    lab_local = label_ref[...] - j * tile_c            # (tile_b, 1) int32
    col = jax.lax.broadcasted_iota(jnp.int32, clamped.shape, 1)
    hit = col == lab_local                             # (tile_b, tile_c)

    # cos(acos(x) + m) * s = x*(s*cos m) - sqrt(1 - x^2)*(s*sin m); non-hit: x*s.
    coef_a = jnp.where(hit, jnp.float32(s * cos_m), jnp.float32(s))
    coef_b = jnp.where(hit, jnp.float32(s * sin_m), jnp.float32(0.0))
    sin_theta = jnp.sqrt(1.0 - clamped * clamped)      # EUP, free slot

    out_ref[...] = (clamped * coef_a - sin_theta * coef_b).astype(out_ref.dtype)


def _round_up(x, a):
    return ((x + a - 1) // a) * a


def _choose_tiles(B, C, dtype):
    elem = jnp.dtype(dtype).itemsize
    sub_align = {4: 8, 2: 16, 1: 32}.get(elem, 8)       # sublane packing per dtype

    # Lane axis: as wide as reasonable for long contiguous DMA bursts.
    tile_c = min(_round_up(C, 128), 8192)

    # Sublane axis: target ~2 MiB blocks (<= ~8 MiB double-buffered in+out).
    target_block_bytes = 2 * 1024 * 1024
    tb = max(sub_align, (target_block_bytes // (tile_c * elem)) // sub_align * sub_align)
    tile_b = min(_round_up(B, sub_align), tb)

    return tile_b, tile_c, sub_align


def arcface_forward(cosine: jax.Array, label: jax.Array,
                    s: float = 64.0, m: float = 0.5,
                    tile_b: int | None = None,
                    tile_c: int | None = None) -> jax.Array:
    """cosine: [B, C] float, label: [B] int (entries in [0, C) or -1)."""
    B, C = cosine.shape
    auto_b, auto_c, sub_align = _choose_tiles(B, C, cosine.dtype)
    if tile_b is None:
        tile_b = auto_b
    if tile_c is None:
        tile_c = auto_c

    # Prefer >= 2 grid steps so both v7x TensorCores get work (and the
    # software pipeline has something to overlap).
    while pl.cdiv(B, tile_b) * pl.cdiv(C, tile_c) < 2:
        if tile_b >= 2 * sub_align and tile_b % sub_align == 0:
            tile_b = _round_up(tile_b // 2, sub_align)
        elif tile_c >= 256 and tile_c % 128 == 0:
            tile_c = _round_up(tile_c // 2, 128)
        else:
            break

    label2d = label.astype(jnp.int32).reshape(B, 1)

    kernel = functools.partial(
        _arcface_kernel,
        s=float(s), cos_m=math.cos(m), sin_m=math.sin(m), tile_c=tile_c)

    grid = (pl.cdiv(B, tile_b), pl.cdiv(C, tile_c))

    elem_bytes = jnp.dtype(cosine.dtype).itemsize
    block_bytes = tile_b * tile_c * elem_bytes
    # in + out blocks, double-buffered, plus labels and slack; cap v7x-safe.
    vmem_limit = int(min(48 * (1 << 20),
                         max(4 * block_bytes + 2 * tile_b * 4 + (1 << 20),
                             16 * (1 << 20))))

    cost = pl.CostEstimate(
        flops=9 * B * C,
        transcendentals=B * C,                         # one sqrt per element
        bytes_accessed=2 * B * C * elem_bytes + B * 4)

    return pl.pallas_call(
        kernel,
        out_shape=jax.ShapeDtypeStruct((B, C), cosine.dtype),
        grid_spec=pltpu.PrefetchScalarGridSpec(
            num_scalar_prefetch=0,
            grid=grid,
            in_specs=[
                pl.BlockSpec((tile_b, tile_c), lambda i, j: (i, j)),   # cosine tile
                pl.BlockSpec((tile_b, 1), lambda i, j: (i, 0)),        # label column
            ],
            out_specs=pl.BlockSpec((tile_b, tile_c), lambda i, j: (i, j)),
        ),
        compiler_params=pltpu.CompilerParams(
            dimension_semantics=("parallel", "parallel"),
            vmem_limit_bytes=vmem_limit),
        cost_estimate=cost,
    )(cosine, label2d)


def _reference(cosine, label, s=64.0, m=0.5):
    # pure-JAX reference mirroring the PyTorch code (acos / cos path)
    clamped = jnp.clip(cosine.astype(jnp.float32), -1.0 + 1e-07, 1.0 - 1e-07)
    theta = jnp.arccos(clamped)
    col = jnp.arange(cosine.shape[1])[None, :]
    hit = (col == label[:, None]) & (label[:, None] != -1)
    theta = theta + jnp.where(hit, m, 0.0)
    return jnp.cos(theta) * s


if __name__ == "__main__":
    key = jax.random.PRNGKey(0)
    k_cos, k_lab, k_mask, k_cos2, k_lab2 = jax.random.split(key, 5)

    # --- Case 1: small, evenly tiled, multiple C tiles forced (tile_c=128) ---
    B, C = 8, 256
    cosine = jax.random.uniform(k_cos, (B, C), jnp.float32,
                                minval=-1.0, maxval=1.0)
    label = jax.random.randint(k_lab, (B,), 0, C, dtype=jnp.int32)
    drop = jax.random.bernoulli(k_mask, 0.25, (B,))
    label = jnp.where(drop, -1, label)     # rows with label == -1 get no margin

    out = jax.block_until_ready(arcface_forward(cosine, label, tile_c=128))
    ref = _reference(cosine, label)
    assert out.shape == (B, C) and out.dtype == jnp.float32
    assert bool(jnp.all(jnp.isfinite(out)))
    assert jnp.allclose(out, ref, atol=2e-3, rtol=1e-4)

    # --- Case 2: default (auto) tiling on the same inputs ---
    out2 = jax.block_until_ready(arcface_forward(cosine, label))
    assert jnp.allclose(out2, ref, atol=2e-3, rtol=1e-4)

    # --- Case 3: C not a multiple of 128 (ragged last C tile, masked) ---
    B3, C3 = 8, 300
    cosine3 = jax.random.uniform(k_cos2, (B3, C3), jnp.float32,
                                 minval=-1.0, maxval=1.0)
    label3 = jax.random.randint(k_lab2, (B3,), 0, C3, dtype=jnp.int32)
    label3 = label3.at[0].set(-1)
    out3 = jax.block_until_ready(arcface_forward(cosine3, label3))
    ref3 = _reference(cosine3, label3)
    assert out3.shape == (B3, C3)
    assert bool(jnp.all(jnp.isfinite(out3)))
    assert jnp.allclose(out3, ref3, atol=2e-3, rtol=1e-4)

    # --- Case 4: bf16 I/O (compute stays f32; halves HBM traffic) ---
    cosine_bf16 = cosine.astype(jnp.bfloat16)
    out4 = jax.block_until_ready(arcface_forward(cosine_bf16, label))
    ref4 = _reference(cosine_bf16.astype(jnp.float32), label)
    assert out4.dtype == jnp.bfloat16
    assert jnp.allclose(out4.astype(jnp.float32), ref4, atol=0.5, rtol=1e-2)

    print("KERNEL_OK")
</pallas_src>

<mosaic_0001>
module attributes {stable_mosaic.version = 11 : i64} {
  func.func @_arcface_kernel(%arg0: i32, %arg1: i32, %arg2: memref<8x128xf32, #tpu.memory_space<vmem>>, %arg3: memref<8x1xi32, #tpu.memory_space<vmem>>, %arg4: memref<8x128xf32, #tpu.memory_space<vmem>>) attributes {dimension_semantics = [#tpu.dimension_semantics<parallel>, #tpu.dimension_semantics<parallel>], iteration_bounds = array<i64: 1, 2>, scalar_prefetch = 0 : i64, scratch_operands = 0 : i64, tpu.core_type = #tpu.core_type<tc>, window_params = [{transform_indices = @transform_0, window_bounds = array<i64: 8, 128>}, {transform_indices = @transform_1, window_bounds = array<i64: 8, 1>}, {transform_indices = @transform_2, window_bounds = array<i64: 8, 128>}]} {
    %c0 = arith.constant 0 : index
    %c0_0 = arith.constant 0 : index
    %0 = vector.load %arg2[%c0, %c0_0] : memref<8x128xf32, #tpu.memory_space<vmem>>, vector<8x128xf32>
    %cst = arith.constant -0.99999988 : f32
    %cst_1 = arith.constant 0.99999988 : f32
    %1 = vector.broadcast %cst : f32 to vector<8x128xf32>
    %2 = arith.maximumf %1, %0 : vector<8x128xf32>
    %3 = vector.broadcast %cst_1 : f32 to vector<8x128xf32>
    %4 = arith.minimumf %3, %2 : vector<8x128xf32>
    %c0_2 = arith.constant 0 : index
    %c0_3 = arith.constant 0 : index
    %5 = vector.load %arg3[%c0_2, %c0_3] : memref<8x1xi32, #tpu.memory_space<vmem>>, vector<8x1xi32>
    %c128_i32 = arith.constant 128 : i32
    %6 = arith.muli %arg1, %c128_i32 : i32
    %7 = vector.broadcast %6 : i32 to vector<8x1xi32>
    %8 = arith.subi %5, %7 : vector<8x1xi32>
    %9 = tpu.iota {dimensions = array<i32: 1>} : vector<8x128xi32>
    %10 = vector.broadcast %8 : vector<8x1xi32> to vector<8x128xi32>
    %11 = arith.cmpi eq, %9, %10 : vector<8x128xi32>
    %cst_4 = arith.constant 56.1652832 : f32
    %cst_5 = arith.constant 6.400000e+01 : f32
    %12 = vector.broadcast %cst_4 : f32 to vector<8x128xf32>
    %13 = vector.broadcast %cst_5 : f32 to vector<8x128xf32>
    %14 = arith.select %11, %12, %13 : vector<8x128xi1>, vector<8x128xf32>
    %cst_6 = arith.constant 30.6832352 : f32
    %cst_7 = arith.constant 0.000000e+00 : f32
    %15 = vector.broadcast %cst_6 : f32 to vector<8x128xf32>
    %16 = vector.broadcast %cst_7 : f32 to vector<8x128xf32>
    %17 = arith.select %11, %15, %16 : vector<8x128xi1>, vector<8x128xf32>
    %18 = arith.mulf %4, %4 : vector<8x128xf32>
    %cst_8 = arith.constant 1.000000e+00 : f32
    %19 = vector.broadcast %cst_8 : f32 to vector<8x128xf32>
    %20 = arith.subf %19, %18 : vector<8x128xf32>
    %21 = math.sqrt %20 : vector<8x128xf32>
    %22 = arith.mulf %4, %14 : vector<8x128xf32>
    %23 = arith.mulf %21, %17 : vector<8x128xf32>
    %24 = arith.subf %22, %23 : vector<8x128xf32>
    %c0_9 = arith.constant 0 : index
    %c0_10 = arith.constant 0 : index
    %25 = vector.load %arg4[%c0_9, %c0_10] : memref<8x128xf32, #tpu.memory_space<vmem>>, vector<8x128xf32>
    tpu.vector_store %arg4[%c0_9, %c0_10], %24 {strides = array<i32>} : memref<8x128xf32, #tpu.memory_space<vmem>>, vector<8x128xf32>,
    return
  }
  func.func @transform_0(%arg0: i32, %arg1: i32) -> (i32, i32) {
    %c0_i32 = arith.constant 0 : i32
    return %arg0, %arg1 : i32, i32
  }
  func.func @transform_1(%arg0: i32, %arg1: i32) -> (i32, i32) {
    %c0_i32 = arith.constant 0 : i32
    %c0_i32_0 = arith.constant 0 : i32
    return %arg0, %c0_i32 : i32, i32
  }
  func.func @transform_2(%arg0: i32, %arg1: i32) -> (i32, i32) {
    %c0_i32 = arith.constant 0 : i32
    return %arg0, %arg1 : i32, i32
  }
}

</mosaic_0001>

<bundles_post_ra>
// kernel: tpu_custom_call.1
= control target key start
LH: loop header
LB: loop body
LE: loop exit
PB: predicated region body
PF: predicated region fallthrough
CT: control target
= control target key end

     0   :  { %7 = vsyncpa [#allocation3], 0  ;;  %s736_s0 = inlined_call_operand.hbm [shape: f32[8,256], index: 0, kind: input, shape index: {}]   ;;  %s737_s1 = inlined_call_operand.vmem [shape: s32[8,1], index: 1, kind: input, shape index: {}]   ;;  %s738_s2 = inlined_call_operand.hbm [shape: f32[8,256], index: 2, kind: output, shape index: {}]  }
   0x1   :  { %9 = vsyncpa [#allocation3 + $0x1], 0 }
   0x2   :  { %10 = vsyncpa [#allocation4], 0 }
   0x3   :  { %12 = vsyncpa [#allocation4 + $0x1], 0  ;;  %s553_s9 = smov 0   ;;  %s555_s10 = smov 0  }
   0x4   :  { %s557_s11 = smov 0   ;;  %s559_s12 = smov 0  }
   0x5   :  { %s561_s13 = smov 0   ;;  %s563_s14 = smov 0  }
   0x6 LB: > { %s335_s15 = sadd.s32 4294967295, %s531_s14   ;;  %s336_s16 = sadd.s32 4294967294, %s531_s14   ;;  %s531_s14 = sphi %s563_s14, %s18_s14   ;;  %s527_s13 = sphi %s561_s13, %s754_s13   ;;  %s523_s12 = sphi %s559_s12, %s753_s12   ;;  %s519_s11 = sphi %s557_s11, %s752_s11   ;;  %s515_s10 = sphi %s555_s10, %s751_s10   ;;  %s511_s9 = sphi %s553_s9, %s750_s9  }
   0x7   : > { %s27_s17 = sadd.s32 1, %s527_s13  ;;  %s39_s18 = sadd.s32 1, %s519_s11 }
   0x8   : > { %p28_p0 = scmp.ge.s32.totalorder %s27_s17, 2  ;;  %p46_p1 = scmp.ne.s32.totalorder %s519_s11, %s515_s10 }
   0x9   : > { %p47_p2 = scmp.eq.s32.totalorder %s531_s14, 0  ;;  %p52_p3 = scmp.ne.s32.totalorder %s515_s10, %s511_s9 }
   0xa   : > { %s756_s17 = smov (%p28_p0, %s27_s17), 0  ;;  %p53_p5 = scmp.eq.s32.totalorder %s335_s15, 0 }
   0xb   : > { %p594_p4 = por %p47_p2, %p46_p1  ;;  %s35_s20 = ssub.s32 %s527_s13, %s756_s17 }
   0xc   : > { %p104_p6 = scmp.eq.s32.totalorder %s335_s15, 1  ;;  %p37_p7 = scmp.eq.s32.totalorder %s35_s20, 0 }
   0xd   : > { %p600_p8 = por %p53_p5, %p52_p3  ;;  %p110_p10 = scmp.eq.s32.totalorder %s336_s16, 1 }
   0xe   : > { %p604_p9 = por %p104_p6, %p46_p1  ;;  %p363_p13 = scmp.lt.s32.totalorder %s531_s14, 2 }
   0xf   : > { %s609_s23 = scalar_select %p37_p7, %s519_s11, %s39_s18  }
  0x10   : > { %s742_s22 = scalar_select %p604_p9, 1, 0 }
  0x11   : > { %p611_p11 = por %p110_p10, %p52_p3  ;;  %s137_s25 = sand.u32 1, %s519_s11  }
  0x12   : > { %s340_s26 = sshll.u32 %s137_s25, 3  ;;  %s341_s27 = sshll.u32 %s527_s13, 7 }
  0x13   : > { %s743_s24 = scalar_select %p611_p11, 1, 0 }
  0x14   : > { %s622_s30 = scalar_lea.hbm %s736_s0, %s341_s27  ;;  %s141_s3 = scalar_lea.vmem [#allocation2], %s340_s26 }
  0x15   : > { %s150_s4 = sshll.u32 %s141_s3, 4  ;;  %p628_p0 = pnand %p363_p13, %p594_p4  ;;  %s624_s4 = int_to_ptr.vmem [resolvable:$true] %s150_s4 }
  0x16   : > { %s138_s6 = scalar_lea.sflag [#allocation3], %s137_s25  ;;  %s419_s7 = scalar_lea.hbm %s622_s30, 128 }
  0x17   : > { %p420_p3 = scmp.ne.s32.totalorder %s622_s30, %s419_s7  ;;  %p421_p5 = pneg %p628_p0 }
  0x18   : > { %s424_s16 = scalar_lea.hbm %s736_s0, 256  ;;  %p425_p4 = scmp.lt.u32.totalorder %s622_s30, %s736_s0 }
  0x19   : > { %p422_p6 = pnand %p421_p5, %p420_p3  ;;  %p426_p10 = scmp.lt.u32.totalorder %s424_s16, %s419_s7 }
  0x1a   : > { %p428_p12 = scmp.lt.u32.totalorder %s419_s7, %s622_s30 }
  0x1b   : > { %p423_p7 = pneg %p422_p6  ;;  %p427_p13 = por %p426_p10, %p425_p4 }
  0x1d   : > { %p429_p1 = por %p428_p12, %p427_p13 }
  0x1f   : > { %p430_p2 = pnand %p429_p1, %p423_p7 }
  0x21   : > { %433 = shalt.err (!%p430_p2)
}
  0x22   : > { %s434_s20 = scalar_lea.vmem %s624_s4, 128  ;;  %s533_s25 = smov [#allocation2]  }
  0x23   : > { %p435_p3 = scmp.ne.s32.totalorder %s624_s4, %s434_s20  ;;  %s439_s26 = sshll.u32 %s533_s25, 4  ;;  %s440_s26 = int_to_ptr.vmem [resolvable:$false] %s439_s26 }
  0x24   : > { %s441_s27 = scalar_lea.vmem %s440_s26, 256  ;;  %p442_p9 = scmp.lt.s32.totalorder %s624_s4, %s440_s26 }
  0x25   : > { %p437_p6 = pnand %p435_p3, %p421_p5  ;;  %p443_p4 = scmp.lt.s32.totalorder %s441_s27, %s434_s20 }
  0x27   : > { %p438_p11 = pneg %p437_p6  ;;  %p444_p10 = por %p443_p4, %p442_p9 }
  0x29   : > { %p445_p12 = pnand %p444_p10, %p438_p11 }
  0x2b   : > { %448 = shalt.err (!%p445_p12)
}
  0x2c   : > { %358 = dma.hbm_to_vmem [thread:$0]  (!%p628_p0), %s622_s30, 128, %s624_s4, %s138_s6  }
  0x2d   : > { %p745_p1 = scmp.lt.s32.totalorder %s531_s14, 3  ;;  %p746_p2 = scmp.ge.s32.totalorder %s531_s14, 1 }
  0x2f   : > { %p156_p5 = pnand %p746_p2, %p745_p1 }
  0x30   : > { %s664_s28 = sand.u32 (!%p156_p5), 1, %s515_s10  }
  0x31   : > { %159 = sbr.rel (%p156_p5) target bundleno = 209 (0xd1), region = 28  ;;  %s343_s29 = sshll.u32 (!%p156_p5), %s664_s28, 3 }
  0x32   : > { %s162_s3 = scalar_lea.sflag (!%p156_p5), [#allocation3], %s664_s28  ;;  %s165_s5 = scalar_lea.vmem (!%p156_p5), [#allocation2], %s343_s29 }
  0x38   : > { %502 = dma.done.wait (%p600_p8), %s162_s3, 128  }
  0x39   : > { %504 = vsyncadd (%p600_p8), %s162_s3, 4294967168  ;;  %v534_v0 = vmov 0   ;;  %s346_s30 = sshll.u32 %s523_s12, 7  ;;  %v197_v2 = vld [vmem:[%s737_s1] sm:$0xff]  ;;  %v201_v9 = vlaneseq  ;;  %v535_v16 = vmov 64.0   ;;  %v536_v18 = vmov 0.0  }
  0x3a   : > { %416 = vset.pattern.permute.xlu0 %v534_v0  ;;  %v199_v1 = vstv %s346_s30  ;;  %v194_v4 = vld [vmem:[%s165_s5] sm:$0xff]  ;;  %s189_s21 = scalar_lea.vmem [#allocation5], %s343_s29  ;;  %s687_s16 = scalar_lea.hbm %s738_s2, %s346_s30 }
  0x3b   : > { %v200_v3 = vsub.s32 %v197_v2, %v199_v1  ;;  %v345_v5 = vclamps-f32 %v194_v4, 0.9999999  ;;  %v202_v12 = vand.u32 127, %v201_v9  ;;  %s238_s7 = sshll.u32 %s189_s21, 4  ;;  %s223_s18 = scalar_lea.sflag [#allocation4], %s664_s28  ;;  %s689_s7 = int_to_ptr.vmem [resolvable:$true] %s238_s7 }
  0x3c   : > { %s449_s19 = scalar_lea.vmem %s689_s7, 128  ;;  %p747_p9 = scmp.ne.s32.totalorder %s742_s22, 0 }
  0x3d   : > { %204 = vperm.xlu0 %416, %v200_v3   ;;  %v209_v6 = vmul.f32 %v345_v5, %v345_v5  ;;  %p450_p8 = scmp.ne.s32.totalorder %s689_s7, %s449_s19  ;;  %s537_s20 = smov [#allocation5]  }
  0x3e   : > { %s453_s12 = sshll.u32 %s537_s20, 4  ;;  %s454_s12 = int_to_ptr.vmem [resolvable:$false] %s453_s12 }
  0x3f   : > { %v210_v7 = vsub.f32 1.0, %v209_v6  ;;  %p451_p11 = pnand %p450_p8, %p747_p9  ;;  %s455_s25 = scalar_lea.vmem %s454_s12, 256 }
  0x40   : > { %p456_p7 = scmp.lt.s32.totalorder %s689_s7, %s454_s12  ;;  %p457_p13 = scmp.lt.s32.totalorder %s455_s25, %s449_s19 }
  0x41   : > { %417 = vrsqrt.f32 %v210_v7  ;;  %vm213_vm0 = vcmp.eq.f32.partialorder %v210_v7, inf  ;;  %v216_v11 = vand.u32 2147483648, %v210_v7  ;;  %vm215_vm1 = vcmp.eq.f32.partialorder %v210_v7, 0.0  ;;  %p452_p0 = pneg %p451_p11 }
  0x42   : > { %p458_p3 = por %p457_p13, %p456_p7 }
  0x44   : > { %p459_p6 = pnand %p458_p3, %p452_p0 }
  0x4b   : > { %v418_v8 = vpop.eup %417 }
  0x4c   : > { %v212_v10 = vmul.f32 %v418_v8, %v210_v7 }
  0x4e   : > { %v214_v13 = vsel %vm213_vm0, %v210_v7, %v212_v10 }
  0x4f   : > { %v217_v15 = vsel %vm215_vm1, %v216_v11, %v214_v13 }
  0xbc   : > { %v205_v14 = vpop.permute.xlu0 %204 }
  0xbd   : > { %vm206_vm2 = vcmp.eq.s32.totalorder %v202_v12, %v205_v14 }
  0xbe   : > { %v207_v17 = vsel %vm206_vm2, 56.165283, %v535_v16  ;;  %v208_v19 = vsel %vm206_vm2, 30.683235, %v536_v18 }
  0xbf   : > { %v218_v20 = vmul.f32 %v345_v5, %v207_v17  ;;  %v219_v21 = vmul.f32 %v217_v15, %v208_v19 }
  0xc1   : > { %v220_v22 = vsub.f32 %v218_v20, %v219_v21 }
  0xc3   : > { %221 = vst [vmem:[%s189_s21] sm:$0xff] %v220_v22 }
  0xc4   : > { %462 = shalt.err (!%p459_p6)
}
  0xc5   : > { %s463_s26 = scalar_lea.hbm %s687_s16, 128  ;;  %s467_s29 = scalar_lea.hbm %s738_s2, 256 }
  0xc6   : > { %p464_p4 = scmp.ne.s32.totalorder %s687_s16, %s463_s26  ;;  %p468_p1 = scmp.lt.u32.totalorder %s687_s16, %s738_s2 }
  0xc7   : > { %p469_p2 = scmp.lt.u32.totalorder %s467_s29, %s463_s26  ;;  %p471_p8 = scmp.lt.u32.totalorder %s463_s26, %s687_s16 }
  0xc8   : > { %p465_p10 = pnand %p464_p4, %p747_p9 }
  0xc9   : > { %p470_p5 = por %p469_p2, %p468_p1 }
  0xca   : > { %p466_p12 = pneg %p465_p10 }
  0xcb   : > { %p472_p11 = por %p471_p8, %p470_p5 }
  0xcd   : > { %p473_p0 = pnand %p472_p11, %p466_p12 }
  0xcf   : > { %476 = shalt.err (!%p473_p0)
}
  0xd0   : > { %353 = dma.vmem_to_hbm [thread:$0]  (%p747_p9), %s689_s7, 128, %s687_s16, %s223_s18  }
  0xd1 PF: > { %s250_s30 = sand.u32 1, %s511_s9   ;;  %p748_p7 = scmp.ne.s32.totalorder %s743_s24, 0 }
  0xd2   : > { %p749_p13 = scmp.ge.s32.totalorder %s531_s14, 2  ;;  %s251_s4 = scalar_lea.sflag [#allocation4], %s250_s30 }
  0xd4   : > { %p360_p3 = pnand %p749_p13, %p748_p7 }
  0xd6   : > { %506 = dma.done.wait (!%p360_p3), %s251_s4, 128  }
  0xd7   : > { %508 = vsyncadd (!%p360_p3), %s251_s4, 4294967168  ;;  %s18_s14 = sadd.s32 1, %s531_s14   ;;  %s750_s9 = smov %s515_s10 }
  0xd8   : > { %p15_p6 = scmp.ge.s32.totalorder %s18_s14, 4   ;;  %s751_s10 = smov %s519_s11 }
  0xd9   : > { %s752_s11 = smov %s609_s23  ;;  %s753_s12 = smov %s527_s13 }
  0xda   : > { %s754_s13 = smov %s756_s17  ;;  %17 = sbr.rel (!%p15_p6) target bundleno = 6 (0x6), region = 76 }
  0xe1   :  { %256 = vsyncpa [#allocation3], 1 }
  0xe2   :  { %258 = vsyncpa [#allocation3 + $0x1], 1 }
  0xe3   :  { %259 = vsyncpa [#allocation4], 1 }
  0xe4   :  { %261 = vsyncpa [#allocation4 + $0x1], 1 }

</bundles_post_ra>
